<compile_context>
chip_gen: v7x
topology: tpu7x:2x2x1
jax: 0.10.0
libtpu: 0.0.40
codegen_flags: <defaults>
</compile_context>

<pallas_src>
import functools

import jax
import jax.numpy as jnp
from jax.experimental import pallas as pl
from jax.experimental.pallas import tpu as pltpu


def _per_block_budget_bytes():
    """Per-block byte target so in+out double-buffered blocks stay well inside
    the scoped-VMEM default (16 MiB v5e, 32 MiB v6e/v7x)."""
    kind = ""
    try:
        kind = jax.devices()[0].device_kind.lower()
    except Exception:
        pass
    if "v6" in kind or "v7" in kind or "7x" in kind:
        return 6 << 20          # 4 * 6 MiB = 24 MiB  < 32 MiB scoped default
    return 3 << 20              # v5e / unknown: 4 * 3 MiB = 12 MiB < 16 MiB


# --------------------------- fused single-pass -------------------------------
def _fused_kernel(x_ref, w_ref, o_ref, *, inv_hw):
    # x_ref: (B, C, HW) resident in VMEM; w_ref: (C_in, C_out) f32 center tap.
    x = x_ref[...]
    mean = jnp.sum(x.astype(jnp.float32), axis=-1) * inv_hw               # (B, C)
    y = jnp.dot(mean, w_ref[...], preferred_element_type=jnp.float32)     # (B, C)
    s = (1.0 / (1.0 + jnp.exp(-y))).astype(x.dtype)                       # sigmoid
    o_ref[...] = x * s[:, :, None]


# ------------------- pass 1: per-row (b*c) spatial sum -----------------------
def _rowsum_kernel(x_ref, sum_ref, *, hw, tc, needs_mask):
    j = pl.program_id(1)                   # reduction axis (last, "arbitrary")

    @pl.when(j == 0)
    def _():
        sum_ref[...] = jnp.zeros_like(sum_ref)

    x = x_ref[...].astype(jnp.float32)     # (tr, tc), f32 accumulation
    if needs_mask:                         # ragged last HW block: zero the pad
        lane = jax.lax.broadcasted_iota(jnp.int32, x.shape, 1)
        x = jnp.where(j * tc + lane < hw, x, 0.0)
    sum_ref[...] += jnp.sum(x, axis=-1, keepdims=True)


# ------------------- pass 2: streaming channel rescale -----------------------
def _rescale_kernel(x_ref, s_ref, o_ref):
    # x_ref: (tr, tc); s_ref: (tr, 1) already in x.dtype.
    o_ref[...] = x_ref[...] * s_ref[...]


def _row_tile(rows):
    return rows if rows <= 512 else 512


def _lane_tile(hw, row_tile, itemsize, budget):
    """Lane-dense column tile: full HW if it fits the per-block budget, else
    the largest multiple of 128 that does (ragged tail handled by cdiv grid)."""
    if hw <= 128 or hw * row_tile * itemsize <= budget:
        return hw
    cols = budget // max(1, row_tile * itemsize)
    return max(128, (cols // 128) * 128)


def aca_attention(x, conv_weight, *, force_two_pass=False):
    """x: (B, C, H, W); conv_weight: (C_out, C_in, K) as in nn.Conv1d(bias=False)."""
    B, C, H, W = x.shape
    C_out, C_in, K = conv_weight.shape
    assert C_out == C and C_in == C, "expected groups=1 Conv1d weight (C, C, K)"
    assert K % 2 == 1, "center-tap reduction requires an odd kernel_size"
    center = (K - 1) // 2

    HW = H * W
    rows = B * C
    itemsize = jnp.dtype(x.dtype).itemsize
    # Conv1d over a length-1 zero-padded sequence == its center tap:
    w_t = conv_weight[:, :, center].T.astype(jnp.float32)        # (C_in, C_out)

    budget = _per_block_budget_bytes()

    # ----------------- fused path: 2x HBM traffic instead of 3x -------------
    x_bytes = rows * HW * itemsize
    w_bytes = C * C * 4
    f32_temp = 0 if x.dtype == jnp.float32 else rows * HW * 4
    if not force_two_pass and (2 * x_bytes + w_bytes + f32_temp) <= 2 * budget:
        x3 = x.reshape(B, C, HW)
        out = pl.pallas_call(
            functools.partial(_fused_kernel, inv_hw=1.0 / float(HW)),
            out_shape=jax.ShapeDtypeStruct((B, C, HW), x.dtype),
        )(x3, w_t)
        return out.reshape(B, C, H, W)

    # ----------------- two-pass streaming path ------------------------------
    x2 = x.reshape(rows, HW)

    # pass 1: per-row spatial sum (f32), reduction axis last
    tr1 = _row_tile(rows)
    tc1 = _lane_tile(HW, tr1, itemsize, budget)
    sums = pl.pallas_call(
        functools.partial(_rowsum_kernel, hw=HW, tc=tc1,
                          needs_mask=(HW % tc1 != 0)),
        out_shape=jax.ShapeDtypeStruct((rows, 1), jnp.float32),
        grid=(pl.cdiv(rows, tr1), pl.cdiv(HW, tc1)),
        in_specs=[pl.BlockSpec((tr1, tc1), lambda i, j: (i, j))],
        out_specs=pl.BlockSpec((tr1, 1), lambda i, j: (i, 0)),
        compiler_params=pltpu.CompilerParams(
            dimension_semantics=("parallel", "arbitrary")),
    )(x2)

    # Tiny one-shot (B,C)@(C,C) center-tap GEMM + sigmoid: left to XLA so the
    # f32 (C,C) weight never gets double-buffered inside the streaming kernels.
    mean = sums.reshape(B, C) * (1.0 / float(HW))
    y = jnp.dot(mean, w_t, preferred_element_type=jnp.float32)
    scale = (1.0 / (1.0 + jnp.exp(-y))).astype(x.dtype).reshape(rows, 1)

    # pass 2: lane-dense streaming rescale (the bandwidth-critical path)
    tr2 = _row_tile(rows)
    tc2 = _lane_tile(HW, tr2, itemsize, budget)
    out2 = pl.pallas_call(
        _rescale_kernel,
        out_shape=jax.ShapeDtypeStruct((rows, HW), x.dtype),
        grid=(pl.cdiv(rows, tr2), pl.cdiv(HW, tc2)),
        in_specs=[
            pl.BlockSpec((tr2, tc2), lambda i, j: (i, j)),
            pl.BlockSpec((tr2, 1), lambda i, j: (i, 0)),
        ],
        out_specs=pl.BlockSpec((tr2, tc2), lambda i, j: (i, j)),
        compiler_params=pltpu.CompilerParams(
            dimension_semantics=("parallel", "parallel")),
    )(x2, scale)

    return out2.reshape(B, C, H, W)


if __name__ == "__main__":
    key = jax.random.PRNGKey(0)
    kx, kw = jax.random.split(key)

    B, C, H, W = 2, 4, 16, 16
    K = 3  # Conv1d kernel_size

    x = jax.random.normal(kx, (B, C, H, W), dtype=jnp.float32)

    # Deterministic synthetic Conv1d weight (out_channels, in_channels, K),
    # bias=False — matches nn.Conv1d(channel, channel, K, padding=1, bias=False).
    fan_in = C * K
    bound = 1.0 / (fan_in ** 0.5)
    conv_weight = jax.random.uniform(
        kw, (C, C, K), minval=-bound, maxval=bound, dtype=jnp.float32)

    # Plain-JAX reference for the exact PyTorch forward semantics.
    mean = jnp.mean(x, axis=(2, 3))                               # (B, C)
    y = mean @ conv_weight[:, :, (K - 1) // 2].T                  # (B, C)
    ref = x * jax.nn.sigmoid(y)[:, :, None, None]

    # Fused single-pass path (small tensors take this route in practice).
    out_fused = jax.block_until_ready(aca_attention(x, conv_weight))
    assert out_fused.shape == x.shape and out_fused.dtype == x.dtype
    assert jnp.allclose(out_fused, ref, atol=1e-5, rtol=1e-5)

    # Two-pass streaming path (what large tensors use) — exercised explicitly.
    out_stream = jax.block_until_ready(
        aca_attention(x, conv_weight, force_two_pass=True))
    assert out_stream.shape == x.shape and out_stream.dtype == x.dtype
    assert jnp.allclose(out_stream, ref, atol=1e-5, rtol=1e-5)

    print("KERNEL_OK")
</pallas_src>

<mosaic_0001>
module attributes {stable_mosaic.version = 11 : i64} {
  func.func @_fused_kernel(%arg0: memref<2x4x256xf32, #tpu.memory_space<vmem>>, %arg1: memref<4x4xf32, #tpu.memory_space<vmem>>, %arg2: memref<2x4x256xf32, #tpu.memory_space<vmem>>) attributes {dimension_semantics = [], scalar_prefetch = 0 : i64, scratch_operands = 0 : i64, tpu.core_type = #tpu.core_type<tc>} {
    %c0 = arith.constant 0 : index
    %c0_0 = arith.constant 0 : index
    %c0_1 = arith.constant 0 : index
    %0 = vector.load %arg0[%c0, %c0_0, %c0_1] : memref<2x4x256xf32, #tpu.memory_space<vmem>>, vector<2x4x256xf32>
    %cst = arith.constant dense<0.000000e+00> : vector<2x4xf32>
    %1 = vector.multi_reduction <add>, %0, %cst [2] : vector<2x4x256xf32> to vector<2x4xf32>
    %cst_2 = arith.constant 3.906250e-03 : f32
    %2 = vector.broadcast %cst_2 : f32 to vector<2x4xf32>
    %3 = arith.mulf %1, %2 : vector<2x4xf32>
    %c0_3 = arith.constant 0 : index
    %c0_4 = arith.constant 0 : index
    %4 = vector.load %arg1[%c0_3, %c0_4] : memref<4x4xf32, #tpu.memory_space<vmem>>, vector<4x4xf32>
    %cst_5 = arith.constant dense<0.000000e+00> : vector<2x4xf32>
    %5 = tpu.matmul %3, %4, %cst_5 {dimension_numbers = #tpu.dot_dimension_numbers<[1], [0], [0], [1], [0, 0, 1, 1], [], []>} : vector<2x4xf32>, vector<4x4xf32>, vector<2x4xf32> -> vector<2x4xf32>
    %cst_6 = arith.constant 0.000000e+00 : f32
    %6 = vector.broadcast %cst_6 : f32 to vector<2x4xf32>
    %7 = arith.subf %6, %5 : vector<2x4xf32>
    %8 = math.exp %7 : vector<2x4xf32>
    %cst_7 = arith.constant 1.000000e+00 : f32
    %9 = vector.broadcast %cst_7 : f32 to vector<2x4xf32>
    %10 = arith.addf %9, %8 : vector<2x4xf32>
    %cst_8 = arith.constant 1.000000e+00 : f32
    %11 = vector.broadcast %cst_8 : f32 to vector<2x4xf32>
    %12 = arith.divf %11, %10 : vector<2x4xf32>
    %13 = vector.shape_cast %12 : vector<2x4xf32> to vector<2x4x1xf32>
    %14 = vector.broadcast %13 : vector<2x4x1xf32> to vector<2x4x256xf32>
    %15 = arith.mulf %0, %14 : vector<2x4x256xf32>
    %c0_9 = arith.constant 0 : index
    %c0_10 = arith.constant 0 : index
    %c0_11 = arith.constant 0 : index
    %16 = vector.load %arg2[%c0_9, %c0_10, %c0_11] : memref<2x4x256xf32, #tpu.memory_space<vmem>>, vector<2x4x256xf32>
    tpu.vector_store %arg2[%c0_9, %c0_10, %c0_11], %15 {strides = array<i32>} : memref<2x4x256xf32, #tpu.memory_space<vmem>>, vector<2x4x256xf32>,
    return
  }
}

</mosaic_0001>

<bundles_post_ra>
// kernel: tpu_custom_call.1
= control target key start
LH: loop header
LB: loop body
LE: loop exit
PB: predicated region body
PF: predicated region fallthrough
CT: control target
= control target key end

     0   :  { %7 = vsyncpa [#allocation3], 0  ;;  %s375_s0 = inlined_call_operand.hbm [shape: f32[2,4,256], index: 0, kind: input, shape index: {}]   ;;  %s376_s1 = inlined_call_operand.hbm [shape: f32[4,4], index: 1, kind: input, shape index: {}]   ;;  %s377_s2 = inlined_call_operand.hbm [shape: f32[2,4,256], index: 2, kind: output, shape index: {}]  }
   0x1   :  { %8 = vsyncpa [#allocation6], 0 }
   0x2   :  { %9 = vsyncpa [#allocation4], 0  ;;  %s305_s9 = smov [#allocation2]   ;;  %s233_s13 = scalar_lea.hbm %s375_s0, 256 }
   0x3   :  { %s15_s10 = sshll.u32 %s305_s9, 4  ;;  %p234_p0 = scmp.ne.s32.totalorder %s375_s0, %s233_s13  ;;  %s16_s10 = int_to_ptr.vmem [resolvable:$true] %s15_s10 }
   0x4   :  { %p237_p1 = scmp.lt.u32.totalorder %s233_s13, %s375_s0 }
   0x6   :  { %p239_p2 = pnand %p237_p1, %p234_p0 }
   0x8   :  { %242 = shalt.err (!%p239_p2)
}
   0x9   :  { %s243_s18 = scalar_lea.vmem %s16_s10, 256  ;;  %p248_p4 = scmp.lt.s32.totalorder %s16_s10, %s16_s10 }
   0xa   :  { %p244_p3 = scmp.ne.s32.totalorder %s16_s10, %s243_s18  ;;  %p249_p5 = scmp.lt.s32.totalorder %s243_s18, %s243_s18 }
   0xc   :  { %p250_p6 = por %p249_p5, %p248_p4 }
   0xe   :  { %p251_p7 = pnand %p250_p6, %p244_p3 }
  0x10   :  { %254 = shalt.err (!%p251_p7)
}
  0x11   :  { %s306_s19 = smov 128   ;;  %s307_s20 = smov 8  }
  0x12   :  { %21 = dma.hbm_to_vmem [thread:$0]  %s375_s0, 256, %s16_s10, [#allocation3], %s306_s19, %s306_s19, %s307_s20  }
  0x13   :  { %s308_s23 = smov [#allocation5]   ;;  %s255_s27 = scalar_lea.hbm %s376_s1, 64 }
  0x14   :  { %s28_s24 = sshll.u32 %s308_s23, 4  ;;  %p256_p8 = scmp.ne.s32.totalorder %s376_s1, %s255_s27  ;;  %s29_s24 = int_to_ptr.vmem [resolvable:$true] %s28_s24 }
  0x15   :  { %p259_p9 = scmp.lt.u32.totalorder %s255_s27, %s376_s1 }
  0x17   :  { %p261_p10 = pnand %p259_p9, %p256_p8 }
  0x19   :  { %264 = shalt.err (!%p261_p10)
}
  0x1a   :  { %s265_s4 = scalar_lea.vmem %s29_s24, 64  ;;  %p270_p12 = scmp.lt.s32.totalorder %s29_s24, %s29_s24 }
  0x1b   :  { %p266_p11 = scmp.ne.s32.totalorder %s29_s24, %s265_s4  ;;  %p271_p13 = scmp.lt.s32.totalorder %s265_s4, %s265_s4 }
  0x1d   :  { %p272_p0 = por %p271_p13, %p270_p12 }
  0x1f   :  { %p273_p1 = pnand %p272_p0, %p266_p11 }
  0x21   :  { %276 = shalt.err (!%p273_p1)
}
  0x22   :  { %31 = dma.hbm_to_vmem [thread:$0]  %s376_s1, 64, %s29_s24, [#allocation6]  }
  0x23   :  { %299 = dma.done.wait [#allocation3], 256  }
  0x24   :  { %300 = vsyncadd [#allocation3], 4294967040 }
  0x25   :  { %301 = dma.done.wait [#allocation6], 64  }
  0x26   :  { %302 = vsyncadd [#allocation6], 4294967232  ;;  %vm46_vm0 = vcmask 1043456   ;;  %v38_v0 = vld [vmem:[#allocation2] sm:$0xff]  ;;  %v39_v1 = vld [vmem:[#allocation2 + $0x8] sm:$0xff]  ;;  %v309_v11 = vmov 0.0   ;;  %v62_v12 = vlaneseq }
  0x27   :  { %v42_v2 = vcombine.high %v38_v0, %v38_v0  ;;  %v47_v3 = vsel %vm46_vm0, %v38_v0, 0.0  ;;  %v43_v4 = vcombine.high %v39_v1, %v39_v1  ;;  %v52_v6 = vsel %vm46_vm0, %v39_v1, 0.0  ;;  %v59_v10 = vld [vmem:[#allocation5] sm:$0xf]  ;;  %214 = vmatprep.subr.mxu0 %v309_v11  ;;  %s312_s1 = smov [#allocation7]  }
  0x28   :  { %vm310_vm1 = vmmov 0   ;;  %215 = vmatpush3.msk.msra.mxu0 %vm46_vm0, %v59_v10  ;;  %v63_v13 = vand.u32 127, %v62_v12  ;;  %v65_v14 = vshrl.u32 %v62_v12, 7  ;;  %vm72_vm2 = vcmask 1041409   ;;  %s197_s6 = sshll.u32 %s312_s1, 4  ;;  %s198_s6 = int_to_ptr.vmem [resolvable:$true] %s197_s6 }
  0x29   :  { %v48_v5 = vsel %vm46_vm0, %v42_v2, 0.0  ;;  %v53_v7 = vsel %vm46_vm0, %v43_v4, 0.0  ;;  %216 = vmatprep.mubr.msk.f32.mxu0 %vm310_vm1, %v309_v11  ;;  %vm74_vm3 = vcmask 31744   ;;  %v311_v34 = vmov 839922192   ;;  %s277_s7 = scalar_lea.vmem %s198_s6, 256  ;;  %p282_p3 = scmp.lt.s32.totalorder %s198_s6, %s198_s6 }
  0x2a   :  { %v49_v8 = vadd.f32 %v48_v5, %v47_v3  ;;  %v54_v9 = vadd.f32 %v53_v7, %v52_v6  ;;  %v66_v16 = vsub.s32 %v63_v13, %v65_v14  ;;  %v158_v29 = vsub.s32 0, %v65_v14  ;;  %p278_p2 = scmp.ne.s32.totalorder %s198_s6, %s277_s7  ;;  %p283_p4 = scmp.lt.s32.totalorder %s277_s7, %s277_s7 }
  0x2b   :  { %v165_v32 = vsub.s32 1, %v65_v14  ;;  %v173_v35 = vunpack.c.l.s4 %v311_v34 }
  0x2c   :  { %50 = vadd.xlane.f32.xlu0 %v49_v8  ;;  %p284_p5 = por %p283_p4, %p282_p3 }
  0x2d   :  { %v174_v36 = vunpack.c.0.s8 %v173_v35 }
  0x2e   :  { %p285_p6 = pnand %p284_p5, %p278_p2 }
  0x2f   :  { %v177_v37 = vsub.s32 %v174_v36, %v65_v14 }
  0x30   :  { %55 = vadd.xlane.f32.xlu0 %v54_v9 }
  0xb9   :  { %v51_v15 = vpop.xlane.xlu0 %50 }
  0xba   :  { %v57_v17 = vmul.f32 0.00390625, %v51_v15 }
  0xbc   :  { %v67_v20 = vrot.slane %v57_v17, %v66_v16 }
  0xbd   :  { %v56_v18 = vpop.xlane.xlu0 %55 }
  0xbe   :  { %v58_v19 = vmul.f32 0.00390625, %v56_v18 }
  0xc0   :  { %v71_v21 = vrot.slane %v58_v19, %v66_v16 }
  0xc2   :  { %v73_v22 = vsel %vm72_vm2, %v71_v21, %v67_v20 }
  0xc3   :  { %217 = vmatmul.mubr.msk.f32.vlgmr.msra.gmra.mrb[0].mxu0 %vm74_vm3, %v73_v22 }
 0x196   :  { %v146_v23 = vpop.f32.mrb[0].mxu0 }
 0x197   :  { %v150_v24 = vsub.f32 0.0, %v146_v23  ;;  %v218_v25 = vpop.f32.mrb[1].mxu0 }
 0x199   :  { %v151_v26 = vmul.f32 1.442695, %v150_v24 }
 0x19b   :  { %229 = vpow2.f32 %v151_v26 }
 0x1a5   :  { %v230_v27 = vpop.eup %229 }
 0x1a6   :  { %v153_v28 = vadd.f32 1.0, %v230_v27 }
 0x1a8   :  { %231 = vrcp.f32 %v153_v28 }
 0x1b2   :  { %v232_v30 = vpop.eup %231 }
 0x1b3   :  { %v159_v31 = vrot.slane %v232_v30, %v158_v29  ;;  %v166_v33 = vrot.slane %v232_v30, %v165_v32 }
 0x1b5   :  { %161 = vbcast.lane.b32.xlu1 %v159_v31, 256 }
 0x1b9   :  { %168 = vbcast.lane.b32.xlu1 %v166_v33, 256 }
 0x227   :  { %v162_v38 = vpop.permute.xlu1 %161 }
 0x228   :  { %v178_v39 = vrot.slane %v162_v38, %v177_v37 }
 0x22a   :  { %v188_v40 = vmul.f32 %v178_v39, %v38_v0 }
 0x22b   :  { %v169_v41 = vpop.permute.xlu1 %168 }
 0x22c   :  { %190 = vst [vmem:[#allocation7] sm:$0xff] %v188_v40  ;;  %v185_v42 = vrot.slane %v169_v41, %v177_v37 }
 0x22e   :  { %v189_v43 = vmul.f32 %v185_v42, %v39_v1 }
 0x230   :  { %191 = vst [vmem:[#allocation7 + $0x8] sm:$0xff] %v189_v43 }
 0x231   :  { %288 = shalt.err (!%p285_p6)
}
 0x232   :  { %s289_s10 = scalar_lea.hbm %s377_s2, 256 }
 0x233   :  { %p290_p7 = scmp.ne.s32.totalorder %s377_s2, %s289_s10  ;;  %p293_p8 = scmp.lt.u32.totalorder %s289_s10, %s377_s2 }
 0x235   :  { %p295_p9 = pnand %p293_p8, %p290_p7 }
 0x237   :  { %298 = shalt.err (!%p295_p9)
}
 0x238   :  { %203 = dma.vmem_to_hbm [thread:$0]  %s198_s6, 256, %s377_s2, [#allocation4], %s306_s19, %s306_s19, %s307_s20  }
 0x239   :  { %303 = dma.done.wait [#allocation4], 256  }
 0x23a   :  { %304 = vsyncadd [#allocation4], 4294967040 }
 0x23b   :  { %207 = vsyncpa [#allocation3], 1 }
 0x23c   :  { %208 = vsyncpa [#allocation6], 1 }
 0x23d   :  { %209 = vsyncpa [#allocation4], 1 }

</bundles_post_ra>
